<compile_context>
chip_gen: v7x
topology: tpu7x:2x2x1
jax: 0.10.0
libtpu: 0.0.40
codegen_flags: <defaults>
</compile_context>

<pallas_src>
import numpy as np
import jax
import jax.numpy as jnp
from jax import lax
from jax.experimental import pallas as pl
from jax.experimental.pallas import tpu as pltpu


def _round_up(x, m):
    return ((x + m - 1) // m) * m


def _pad2(a, rows, cols):
    return jnp.pad(a, ((0, rows - a.shape[0]), (0, cols - a.shape[1])))


# dot_general dimension numbers for "A @ B.T": contract the last axis of both operands
# (avoids any in-kernel transpose of a computed slab).
_DN_RHS_T = (((1,), (1,)), ((), ()))


def _ei_dense_kernel(x_ref, wex_ref, xwix_ref, weiT_ref, b_ref, o_ref, acc_ref):
    k = pl.program_id(2)

    @pl.when(k == 0)
    def _init():
        acc_ref[...] = jnp.zeros_like(acc_ref)

    # Hot loop: one dense MXU dot per step — acc += x_tile @ Wex_tile.T
    acc_ref[...] += lax.dot_general(
        x_ref[...], wex_ref[...], _DN_RHS_T, preferred_element_type=jnp.float32)

    @pl.when(k == pl.num_programs(2) - 1)
    def _finalize():
        # Subtractive inhibition (xwix precomputed in the wrapper, Wei stored
        # transposed & f32): inh = (x @ Wix.T) @ Wei.T, done once per output tile.
        inh = jnp.dot(xwix_ref[...], weiT_ref[...],
                      preferred_element_type=jnp.float32)
        # Bias added only here (not every k step); all finalize math in f32.
        o_ref[...] = (acc_ref[...] - inh + b_ref[...]).astype(o_ref.dtype)


def prepare_ei_dense_params(wex, wix, wei, bias, *, tn=512, tk=1024,
                            compute_dtype=jnp.bfloat16):
    """Pad/cast the static layer parameters ONCE (hoisted out of the per-call path).

    wex: (ne, n_input); wix: (ni, n_input); wei: (ne, ni); bias: (ne, 1).
    (split_bias=True would simply pass bias = bias_pos + bias_neg here.)
    """
    ne, n_input = wex.shape
    ni = wix.shape[0]

    tn = min(tn, _round_up(ne, 128))        # lane-dense output tile
    tk = min(tk, _round_up(n_input, 128))   # lane-dense contraction tile
    ne_p = _round_up(ne, tn)
    nin_p = _round_up(n_input, tk)
    ni_p = _round_up(ni, 8)                 # tiny ni, sublane-aligned once

    wex_p = _pad2(wex.astype(compute_dtype), ne_p, nin_p)
    wix_p = _pad2(wix.astype(compute_dtype), ni_p, nin_p)
    # Wei transposed -> lane axis is the dense ne axis; kept f32 (finalize dot is tiny).
    weiT_p = _pad2(wei.astype(jnp.float32).T, ni_p, ne_p)
    # Bias as a lane-major f32 row so the batch broadcast maps onto sublanes.
    b_row = jnp.pad(bias.reshape(1, ne).astype(jnp.float32),
                    ((0, 0), (0, ne_p - ne)))

    return dict(wex=wex_p, wix=wix_p, weiT=weiT_p, b=b_row,
                ne=ne, n_input=n_input, ni_p=ni_p, ne_p=ne_p, nin_p=nin_p,
                tn=tn, tk=tk, compute_dtype=compute_dtype)


def ei_dense_forward(x, params, *, tb=512):
    """EiDenseLayer forward.  x: (B, n_input) -> (B, ne) float32."""
    ne, n_input = params["ne"], params["n_input"]
    ne_p, nin_p, ni_p = params["ne_p"], params["nin_p"], params["ni_p"]
    tn, tk = params["tn"], params["tk"]
    cdt = params["compute_dtype"]

    B = x.shape[0]
    tb = min(tb, _round_up(B, 8))
    B_p = _round_up(B, tb)

    # v7x (2 TCs/chip): guarantee a "parallel" grid axis with >=2 iterations when the
    # problem allows it, so megacore sharding actually has work to split.
    if B_p // tb == 1 and ne_p // tn == 1:
        if tn % 256 == 0:
            tn //= 2
        elif tb % 16 == 0:
            tb //= 2
            B_p = _round_up(B, tb)

    x_c = x.astype(cdt)
    if (B_p != B) or (nin_p != n_input):
        x_p = _pad2(x_c, B_p, nin_p)
    else:
        x_p = x_c

    # Inhibitory drive hoisted out of the kernel's k-loop: (B_p, ni_p), f32 accumulate.
    xwix = jnp.dot(x_p, params["wix"].T, preferred_element_type=jnp.float32)

    grid = (B_p // tb, ne_p // tn, nin_p // tk)

    out = pl.pallas_call(
        _ei_dense_kernel,
        out_shape=jax.ShapeDtypeStruct((B_p, ne_p), jnp.float32),
        grid_spec=pltpu.PrefetchScalarGridSpec(
            num_scalar_prefetch=0,
            grid=grid,
            in_specs=[
                pl.BlockSpec((tb, tk), lambda i, j, k: (i, k)),     # x
                pl.BlockSpec((tn, tk), lambda i, j, k: (j, k)),     # Wex
                pl.BlockSpec((tb, ni_p), lambda i, j, k: (i, 0)),   # x @ Wix.T (f32)
                pl.BlockSpec((ni_p, tn), lambda i, j, k: (0, j)),   # Wei.T    (f32)
                pl.BlockSpec((1, tn), lambda i, j, k: (0, j)),      # bias row (f32)
            ],
            out_specs=pl.BlockSpec((tb, tn), lambda i, j, k: (i, j)),
            scratch_shapes=[pltpu.VMEM((tb, tn), jnp.float32)],     # z accumulator
        ),
        compiler_params=pltpu.CompilerParams(
            dimension_semantics=("parallel", "parallel", "arbitrary"),
            vmem_limit_bytes=48 * 1024 * 1024),
    )(x_p, params["wex"], xwix, params["weiT"], params["b"])

    if (B_p != B) or (ne_p != ne):
        out = out[:B, :ne]
    return out


def init_ei_dense_params(n_input, ne, ni_frac=0.1, numerator=2, k=1, seed=0):
    """Deterministic re-implementation of EiDenseLayer.init_weights (lognormal)."""
    ni = int(ne * ni_frac) if isinstance(ni_frac, float) else ni_frac
    rng = np.random.default_rng(seed)

    target_std = np.sqrt(numerator * ne / (n_input * (ne - 1)))
    mean, var = target_std * k, target_std ** 2
    mu = np.log(mean ** 2 / np.sqrt(mean ** 2 + var))
    sigma = np.sqrt(np.log(1 + var / mean ** 2))

    Wex = rng.lognormal(mu, sigma, size=(ne, n_input))
    Wei = rng.lognormal(mu, sigma, size=(ne, ni))
    Wei /= Wei.sum(axis=1, keepdims=True)
    Wix = np.ones((ni, 1)) * Wex.mean(axis=0, keepdims=True)
    bias = np.zeros((ne, 1))  # use_bias=True, split_bias=False -> zeros

    return (
        jnp.asarray(Wex, jnp.float32),
        jnp.asarray(Wix, jnp.float32),
        jnp.asarray(Wei, jnp.float32),
        jnp.asarray(bias, jnp.float32),
    )


if __name__ == "__main__":
    # Small shapes consistent with the module: batch=8, n_input=32, ne=32, ni=int(0.1*32)=3
    B, n_input, ne = 8, 32, 32
    wex, wix, wei, bias = init_ei_dense_params(n_input, ne, ni_frac=0.1, seed=0)

    key = jax.random.PRNGKey(0)
    x = jax.random.normal(key, (B, n_input), dtype=jnp.float32)

    # Reference in plain JAX (same math as the PyTorch forward, nonlinearity=None).
    W = wex - wei @ wix
    ref = x @ W.T + bias.T

    # Default path: bf16 compute, f32 accumulation + finalize.
    params_bf16 = prepare_ei_dense_params(wex, wix, wei, bias)
    out = jax.block_until_ready(ei_dense_forward(x, params_bf16))
    assert out.shape == (B, ne)
    np.testing.assert_allclose(np.asarray(out), np.asarray(ref), rtol=5e-2, atol=5e-2)

    # f32 compute path for a tight numerical check of the kernel structure.
    params_f32 = prepare_ei_dense_params(wex, wix, wei, bias,
                                         compute_dtype=jnp.float32)
    out32 = jax.block_until_ready(ei_dense_forward(x, params_f32))
    np.testing.assert_allclose(np.asarray(out32), np.asarray(ref), rtol=1e-4, atol=1e-4)

    print("KERNEL_OK")
</pallas_src>

<mosaic_0001>
module attributes {stable_mosaic.version = 11 : i64} {
  func.func @_ei_dense_kernel(%arg0: i32, %arg1: i32, %arg2: i32, %arg3: memref<8x128xbf16, #tpu.memory_space<vmem>>, %arg4: memref<128x128xbf16, #tpu.memory_space<vmem>>, %arg5: memref<8x8xf32, #tpu.memory_space<vmem>>, %arg6: memref<8x128xf32, #tpu.memory_space<vmem>>, %arg7: memref<1x128xf32, #tpu.memory_space<vmem>>, %arg8: memref<8x128xf32, #tpu.memory_space<vmem>>, %arg9: memref<8x128xf32, #tpu.memory_space<vmem>>) attributes {dimension_semantics = [#tpu.dimension_semantics<parallel>, #tpu.dimension_semantics<parallel>, #tpu.dimension_semantics<arbitrary>], iteration_bounds = array<i64: 1, 1, 1>, scalar_prefetch = 0 : i64, scratch_operands = 1 : i64, tpu.core_type = #tpu.core_type<tc>, window_params = [{transform_indices = @transform_0, window_bounds = array<i64: 8, 128>}, {transform_indices = @transform_1, window_bounds = array<i64: 128, 128>}, {transform_indices = @transform_2, window_bounds = array<i64: 8, 8>}, {transform_indices = @transform_3, window_bounds = array<i64: 8, 128>}, {transform_indices = @transform_4, window_bounds = array<i64: 1, 128>}, {transform_indices = @transform_5, window_bounds = array<i64: 8, 128>}]} {
    %c0_i32 = arith.constant 0 : i32
    %0 = arith.cmpi eq, %arg2, %c0_i32 : i32
    %1 = arith.extui %0 : i1 to i32
    %c0_i32_0 = arith.constant 0 : i32
    %2 = arith.cmpi ne, %1, %c0_i32_0 : i32
    scf.if %2 {
      %cst_10 = arith.constant 0.000000e+00 : f32
      %12 = vector.broadcast %cst_10 : f32 to vector<8x128xf32>
      %c0_11 = arith.constant 0 : index
      %c0_12 = arith.constant 0 : index
      %13 = vector.load %arg9[%c0_11, %c0_12] : memref<8x128xf32, #tpu.memory_space<vmem>>, vector<8x128xf32>
      tpu.vector_store %arg9[%c0_11, %c0_12], %12 {strides = array<i32>} : memref<8x128xf32, #tpu.memory_space<vmem>>, vector<8x128xf32>,
    } else {
    }
    %c0 = arith.constant 0 : index
    %c0_1 = arith.constant 0 : index
    %3 = vector.load %arg9[%c0, %c0_1] : memref<8x128xf32, #tpu.memory_space<vmem>>, vector<8x128xf32>
    %c0_2 = arith.constant 0 : index
    %c0_3 = arith.constant 0 : index
    %4 = vector.load %arg3[%c0_2, %c0_3] : memref<8x128xbf16, #tpu.memory_space<vmem>>, vector<8x128xbf16>
    %c0_4 = arith.constant 0 : index
    %c0_5 = arith.constant 0 : index
    %5 = vector.load %arg4[%c0_4, %c0_5] : memref<128x128xbf16, #tpu.memory_space<vmem>>, vector<128x128xbf16>
    %cst = arith.constant dense<0.000000e+00> : vector<8x128xf32>
    %6 = tpu.matmul %4, %5, %cst {dimension_numbers = #tpu.dot_dimension_numbers<[1], [1], [0], [0], [0, 0, 1, 0], [], []>} : vector<8x128xbf16>, vector<128x128xbf16>, vector<8x128xf32> -> vector<8x128xf32>
    %7 = arith.addf %3, %6 : vector<8x128xf32>
    %c0_6 = arith.constant 0 : index
    %c0_7 = arith.constant 0 : index
    %8 = vector.load %arg9[%c0_6, %c0_7] : memref<8x128xf32, #tpu.memory_space<vmem>>, vector<8x128xf32>
    tpu.vector_store %arg9[%c0_6, %c0_7], %7 {strides = array<i32>} : memref<8x128xf32, #tpu.memory_space<vmem>>, vector<8x128xf32>,
    %c0_i32_8 = arith.constant 0 : i32
    %9 = arith.cmpi eq, %arg2, %c0_i32_8 : i32
    %10 = arith.extui %9 : i1 to i32
    %c0_i32_9 = arith.constant 0 : i32
    %11 = arith.cmpi ne, %10, %c0_i32_9 : i32
    scf.if %11 {
      %c0_10 = arith.constant 0 : index
      %c0_11 = arith.constant 0 : index
      %12 = vector.load %arg5[%c0_10, %c0_11] : memref<8x8xf32, #tpu.memory_space<vmem>>, vector<8x8xf32>
      %c0_12 = arith.constant 0 : index
      %c0_13 = arith.constant 0 : index
      %13 = vector.load %arg6[%c0_12, %c0_13] : memref<8x128xf32, #tpu.memory_space<vmem>>, vector<8x128xf32>
      %cst_14 = arith.constant dense<0.000000e+00> : vector<8x128xf32>
      %14 = tpu.matmul %12, %13, %cst_14 {dimension_numbers = #tpu.dot_dimension_numbers<[1], [0], [0], [1], [0, 0, 1, 1], [], []>} : vector<8x8xf32>, vector<8x128xf32>, vector<8x128xf32> -> vector<8x128xf32>
      %c0_15 = arith.constant 0 : index
      %c0_16 = arith.constant 0 : index
      %15 = vector.load %arg9[%c0_15, %c0_16] : memref<8x128xf32, #tpu.memory_space<vmem>>, vector<8x128xf32>
      %16 = arith.subf %15, %14 : vector<8x128xf32>
      %c0_17 = arith.constant 0 : index
      %c0_18 = arith.constant 0 : index
      %17 = vector.load %arg7[%c0_17, %c0_18] : memref<1x128xf32, #tpu.memory_space<vmem>>, vector<1x128xf32>
      %18 = vector.broadcast %17 : vector<1x128xf32> to vector<8x128xf32>
      %19 = arith.addf %16, %18 : vector<8x128xf32>
      %c0_19 = arith.constant 0 : index
      %c0_20 = arith.constant 0 : index
      %20 = vector.load %arg8[%c0_19, %c0_20] : memref<8x128xf32, #tpu.memory_space<vmem>>, vector<8x128xf32>
      tpu.vector_store %arg8[%c0_19, %c0_20], %19 {strides = array<i32>} : memref<8x128xf32, #tpu.memory_space<vmem>>, vector<8x128xf32>,
    } else {
    }
    return
  }
  func.func @transform_0(%arg0: i32, %arg1: i32, %arg2: i32) -> (i32, i32) {
    %c0_i32 = arith.constant 0 : i32
    return %arg0, %arg2 : i32, i32
  }
  func.func @transform_1(%arg0: i32, %arg1: i32, %arg2: i32) -> (i32, i32) {
    %c0_i32 = arith.constant 0 : i32
    return %arg1, %arg2 : i32, i32
  }
  func.func @transform_2(%arg0: i32, %arg1: i32, %arg2: i32) -> (i32, i32) {
    %c0_i32 = arith.constant 0 : i32
    %c0_i32_0 = arith.constant 0 : i32
    return %arg0, %c0_i32 : i32, i32
  }
  func.func @transform_3(%arg0: i32, %arg1: i32, %arg2: i32) -> (i32, i32) {
    %c0_i32 = arith.constant 0 : i32
    %c0_i32_0 = arith.constant 0 : i32
    return %c0_i32, %arg1 : i32, i32
  }
  func.func @transform_4(%arg0: i32, %arg1: i32, %arg2: i32) -> (i32, i32) {
    %c0_i32 = arith.constant 0 : i32
    %c0_i32_0 = arith.constant 0 : i32
    return %c0_i32, %arg1 : i32, i32
  }
  func.func @transform_5(%arg0: i32, %arg1: i32, %arg2: i32) -> (i32, i32) {
    %c0_i32 = arith.constant 0 : i32
    return %arg0, %arg1 : i32, i32
  }
}

</mosaic_0001>

<bundles_post_ra>
// kernel: tpu_custom_call.1
= control target key start
LH: loop header
LB: loop body
LE: loop exit
PB: predicated region body
PF: predicated region fallthrough
CT: control target
= control target key end

     0   :  { %10 = vsyncpa [#allocation4], 0  ;;  %s526_s0 = inlined_call_operand.hbm [shape: bf16[8,128], index: 0, kind: input, shape index: {}]   ;;  %s527_s1 = inlined_call_operand.hbm [shape: bf16[128,128], index: 1, kind: input, shape index: {}]   ;;  %s528_s2 = inlined_call_operand.hbm [shape: f32[8,8], index: 2, kind: input, shape index: {}]   ;;  %s529_s3 = inlined_call_operand.vmem [shape: f32[8,128], index: 3, kind: input, shape index: {}]   ;;  %s530_s4 = inlined_call_operand.vmem [shape: f32[1,128], index: 4, kind: input, shape index: {}]   ;;  %s531_s5 = inlined_call_operand.hbm [shape: f32[8,128], index: 5, kind: output, shape index: {}]  }
   0x1   :  { %11 = vsyncpa [#allocation7], 0 }
   0x2   :  { %12 = vsyncpa [#allocation5], 0  ;;  %s434_s18 = smov [#allocation6]   ;;  %s340_s22 = scalar_lea.hbm %s527_s1, 1024 }
   0x3   :  { %s28_s19 = sshll.u32 %s434_s18, 4  ;;  %p341_p0 = scmp.ne.s32.totalorder %s527_s1, %s340_s22  ;;  %s29_s19 = int_to_ptr.vmem [resolvable:$true] %s28_s19 }
   0x4   :  { %p344_p1 = scmp.lt.u32.totalorder %s340_s22, %s527_s1 }
   0x6   :  { %p346_p2 = pnand %p344_p1, %p341_p0 }
   0x8   :  { %349 = shalt.err (!%p346_p2)
}
   0x9   :  { %s350_s27 = scalar_lea.vmem %s29_s19, 1024  ;;  %p355_p4 = scmp.lt.s32.totalorder %s29_s19, %s29_s19 }
   0xa   :  { %p351_p3 = scmp.ne.s32.totalorder %s29_s19, %s350_s27  ;;  %p356_p5 = scmp.lt.s32.totalorder %s350_s27, %s350_s27 }
   0xc   :  { %p357_p6 = por %p356_p5, %p355_p4 }
   0xe   :  { %p358_p7 = pnand %p357_p6, %p351_p3 }
  0x10   :  { %361 = shalt.err (!%p358_p7)
}
  0x11   :  { %s435_s28 = smov 64   ;;  %s436_s29 = smov 4  }
  0x12   :  { %34 = dma.hbm_to_vmem [thread:$0]  %s527_s1, 1024, %s29_s19, [#allocation7], %s435_s28, %s435_s28, %s436_s29  }
  0x13   :  { %s437_s7 = smov [#allocation3]   ;;  %s438_s9 = smov [#allocation8]  }
  0x14   :  { %s19_s8 = sshll.u32 %s437_s7, 4  ;;  %s41_s10 = sshll.u32 %s438_s9, 4  ;;  %s20_s8 = int_to_ptr.vmem [resolvable:$true] %s19_s8  ;;  %s42_s10 = int_to_ptr.vmem [resolvable:$true] %s41_s10 }
  0x15   :  { %s362_s13 = scalar_lea.hbm %s526_s0, 64 }
  0x16   :  { %p363_p8 = scmp.ne.s32.totalorder %s526_s0, %s362_s13  ;;  %p366_p9 = scmp.lt.u32.totalorder %s362_s13, %s526_s0 }
  0x18   :  { %p368_p10 = pnand %p366_p9, %p363_p8 }
  0x1a   :  { %371 = shalt.err (!%p368_p10)
}
  0x1b   :  { %s372_s1 = scalar_lea.vmem %s20_s8, 64  ;;  %p377_p12 = scmp.lt.s32.totalorder %s20_s8, %s20_s8 }
  0x1c   :  { %p373_p11 = scmp.ne.s32.totalorder %s20_s8, %s372_s1  ;;  %p378_p13 = scmp.lt.s32.totalorder %s372_s1, %s372_s1 }
  0x1e   :  { %p379_p0 = por %p378_p13, %p377_p12 }
  0x20   :  { %p380_p1 = pnand %p379_p0, %p373_p11 }
  0x22   :  { %383 = shalt.err (!%p380_p1)
}
  0x23   :  { %22 = dma.hbm_to_vmem [thread:$0]  %s526_s0, 64, %s20_s8, [#allocation4]  }
  0x24   :  { %s384_s22 = scalar_lea.hbm %s528_s2, 128 }
  0x25   :  { %p385_p2 = scmp.ne.s32.totalorder %s528_s2, %s384_s22  ;;  %p388_p3 = scmp.lt.u32.totalorder %s384_s22, %s528_s2 }
  0x27   :  { %p390_p4 = pnand %p388_p3, %p385_p2 }
  0x29   :  { %393 = shalt.err (!%p390_p4)
}
  0x2a   :  { %s394_s27 = scalar_lea.vmem %s42_s10, 128  ;;  %p399_p6 = scmp.lt.s32.totalorder %s42_s10, %s42_s10 }
  0x2b   :  { %p395_p5 = scmp.ne.s32.totalorder %s42_s10, %s394_s27  ;;  %p400_p7 = scmp.lt.s32.totalorder %s394_s27, %s394_s27 }
  0x2d   :  { %p401_p8 = por %p400_p7, %p399_p6 }
  0x2f   :  { %p402_p9 = pnand %p401_p8, %p395_p5 }
  0x31   :  { %405 = shalt.err (!%p402_p9)
}
  0x32   :  { %44 = dma.hbm_to_vmem [thread:$0]  %s528_s2, 128, %s42_s10, [#allocation7]  }
  0x33   :  { %428 = dma.done.wait [#allocation4], 64  }
  0x34   :  { %429 = vsyncadd [#allocation4], 4294967232 }
  0x35   :  { %430 = dma.done.wait [#allocation7], 1152  }
  0x36   :  { %431 = vsyncadd [#allocation7], 4294966144  ;;  %v439_v0 = vmov 0.0   ;;  %vm440_vm0 = vmmov 0   ;;  %v332_v1 = vld [vmem:[#allocation6] sm:$0xff]   ;;  %v333_v2 = vld [vmem:[#allocation6 + $0x8] sm:$0xff]  }
  0x37   :  { %299 = vmatprep.subr.bf16.mxu0 %v439_v0  ;;  %319 = vmatprep.subr.mxu1 %v439_v0  ;;  %vm177_vm1 = vcmask 64512   ;;  %v176_v3 = vld [vmem:[%s529_s3] sm:$0xff]  ;;  %v175_v4 = vld [vmem:[#allocation8] sm:$0xff]  ;;  %v337_v8 = vld [vmem:[#allocation6 + $0x28] sm:$0xff]   ;;  %s441_s6 = smov [#allocation9]  }
  0x38   :  { %321 = vmatprep.mubr.msk.f32.mxu1 %vm440_vm0, %v439_v0  ;;  %315 = vmatprep.mubr.msk.bf16.mxu0 %vm440_vm0, %v439_v0  ;;  %v334_v5 = vld [vmem:[#allocation6 + $0x10] sm:$0xff]   ;;  %v335_v6 = vld [vmem:[#allocation6 + $0x18] sm:$0xff]   ;;  %v336_v7 = vld [vmem:[#allocation6 + $0x20] sm:$0xff]   ;;  %s268_s7 = sshll.u32 %s441_s6, 4  ;;  %s269_s7 = int_to_ptr.vmem [resolvable:$true] %s268_s7 }
  0x39   :  { %300 = vmatpush3.bf16.xpose.msra.mxu0 %v332_v1  ;;  %320 = vmatpush3.msra.mxu1 %v176_v3  ;;  %v338_v9 = vld [vmem:[#allocation6 + $0x30] sm:$0xff]   ;;  %v339_v10 = vld [vmem:[#allocation6 + $0x38] sm:$0xff]   ;;  %s406_s8 = scalar_lea.vmem %s269_s7, 128  ;;  %p411_p11 = scmp.lt.s32.totalorder %s269_s7, %s269_s7 }
  0x3a   :  { %301 = vmatprep.subr.bf16.mxu0 %v439_v0  ;;  %322 = vmatmul.mubr.msk.f32.vlgmr.msra.gmra.mrb[0].mxu1 %vm177_vm1, %v175_v4  ;;  %v65_v11 = vld [vmem:[#allocation3] sm:$0xf]  ;;  %v287_v15 = vld [vmem:[%s530_s4] ss:$0 sm:$0xff]  ;;  %p407_p10 = scmp.ne.s32.totalorder %s269_s7, %s406_s8  ;;  %p412_p12 = scmp.lt.s32.totalorder %s406_s8, %s406_s8 }
  0x3c   :  { %p413_p13 = por %p412_p12, %p411_p11 }
  0x3e   :  { %p414_p0 = pnand %p413_p13, %p407_p10 }
  0x41   :  { %302 = vmatpush3.bf16.xpose.msra.mxu0 %v333_v2 }
  0x42   :  { %303 = vmatprep.subr.bf16.mxu0 %v439_v0 }
  0x49   :  { %304 = vmatpush3.bf16.xpose.msra.mxu0 %v334_v5 }
  0x4a   :  { %305 = vmatprep.subr.bf16.mxu0 %v439_v0 }
  0x51   :  { %306 = vmatpush3.bf16.xpose.msra.mxu0 %v335_v6 }
  0x52   :  { %307 = vmatprep.subr.bf16.mxu0 %v439_v0 }
  0x59   :  { %308 = vmatpush3.bf16.xpose.msra.mxu0 %v336_v7 }
  0x5a   :  { %309 = vmatprep.subr.bf16.mxu0 %v439_v0 }
  0x61   :  { %310 = vmatpush3.bf16.xpose.msra.mxu0 %v337_v8 }
  0x62   :  { %311 = vmatprep.subr.bf16.mxu0 %v439_v0 }
  0x69   :  { %312 = vmatpush3.bf16.xpose.msra.mxu0 %v338_v9 }
  0x6a   :  { %313 = vmatprep.subr.bf16.mxu0 %v439_v0 }
  0x71   :  { %314 = vmatpush3.bf16.xpose.msra.mxu0 %v339_v10 }
  0x78   :  { %316 = vmatmul.mubr.bf16.vlgmr.msra.gmra.mrb[0].mxu0 %v65_v11 }
 0x10d   :  { %v247_v12 = vpop.f32.mrb[0].mxu1 }
 0x10e   :  { %v323_v13 = vpop.f32.mrb[1].mxu1 }
 0x14b   :  { %v164_v14 = vpop.f32.mrb[0].mxu0 }
 0x14c   :  { %v252_v16 = vsub.f32 %v164_v14, %v247_v12  ;;  %v317_v17 = vpop.f32.mrb[1].mxu0 }
 0x14d   :  { %v167_v18 = vpop.f32.mrb[2].mxu0 }
 0x14e   :  { %v260_v19 = vadd.f32 %v287_v15, %v252_v16  ;;  %v318_v20 = vpop.f32.mrb[3].mxu0 }
 0x150   :  { %261 = vst [vmem:[#allocation9] sm:$0xff] %v260_v19 }
 0x151   :  { %417 = shalt.err (!%p414_p0)
}
 0x152   :  { %s418_s4 = scalar_lea.hbm %s531_s5, 128 }
 0x153   :  { %p419_p1 = scmp.ne.s32.totalorder %s531_s5, %s418_s4  ;;  %p422_p2 = scmp.lt.u32.totalorder %s418_s4, %s531_s5 }
 0x155   :  { %p424_p3 = pnand %p422_p2, %p419_p1 }
 0x157   :  { %427 = shalt.err (!%p424_p3)
}
 0x158   :  { %271 = dma.vmem_to_hbm [thread:$0]  %s269_s7, 128, %s531_s5, [#allocation5]  }
 0x159   :  { %432 = dma.done.wait [#allocation5], 128  }
 0x15a   :  { %433 = vsyncadd [#allocation5], 4294967168 }
 0x15b   :  { %275 = vsyncpa [#allocation4], 1 }
 0x15c   :  { %276 = vsyncpa [#allocation7], 1 }
 0x15d   :  { %277 = vsyncpa [#allocation5], 1 }

</bundles_post_ra>
